<compile_context>
chip_gen: v7x
topology: tpu7x:2x2x1
jax: 0.10.0
libtpu: 0.0.40
codegen_flags: <defaults>
</compile_context>

<pallas_src>
import functools

import jax
import jax.numpy as jnp
from jax.experimental import pallas as pl
from jax.experimental.pallas import tpu as pltpu

_HIDDEN = 256
_MAX_TILE_B = 2048        # v5e scoped-VMEM safety cap
_DEFAULT_TILE_B = 2048    # multiple of 256: clean MXU mapping, amortizes grid-step overhead


def _round_up(x, m):
    return ((x + m - 1) // m) * m


def _pick_batch_tile(batch, tile_b):
    """Pick the batch tile.

    Large batches: multiple of 256 (MXU-friendly) and at least 2 grid steps so
    the "parallel" batch axis can be sharded over v7x's two TensorCores.
    Small batches: a single 8-aligned tile (Pallas masks the padded tail rows).
    """
    tile_b = max(256, min(tile_b, _MAX_TILE_B))
    if batch <= 256:
        return _round_up(batch, 8)
    return min(tile_b, _round_up(pl.cdiv(batch, 2), 256))


def _qnet_kernel(x_ref, a_ref, w1s_ref, w1a_ref, b1_ref, w2_ref, b2_ref,
                 w3_ref, b3_ref, o_ref):
    # fc1: cat(x, a) @ W1  ==  x @ W1[:S] + a @ W1[S:]   (concat fused away).
    # astype is a no-op if the caller already feeds bf16 activations.
    h1 = jnp.dot(x_ref[...].astype(jnp.bfloat16), w1s_ref[...],
                 preferred_element_type=jnp.float32)
    h1 = h1 + jnp.dot(a_ref[...].astype(jnp.bfloat16), w1a_ref[...],
                      preferred_element_type=jnp.float32)
    h1 = jnp.maximum(h1 + b1_ref[...], 0.0)

    # fc2 + relu (bf16 operands, f32 accumulate).
    h2 = jnp.dot(h1.astype(jnp.bfloat16), w2_ref[...],
                 preferred_element_type=jnp.float32)
    h2 = jnp.maximum(h2 + b2_ref[...], 0.0)

    # fc3: single output unit -> VPU multiply + XLU lane reduction (avoids an
    # MXU matmul with 127 dead columns).  Transpose the (tb, 1) column to a
    # lane-dense (1, tb) row before storing (full-lane vst, no masked stores).
    q_col = jnp.sum(h2 * w3_ref[...], axis=-1, keepdims=True) + b3_ref[...]   # (tb, 1)
    o_ref[...] = jnp.transpose(q_col, (1, 0))                                 # (1, tb)


def pack_qnetwork_params(params, state_dim):
    """One-time packing (hoisted out of the per-call path): split fc1 at the
    state/action concat boundary, cast MXU weights to bf16, reshape biases and
    the fc3 weight to 2-D rows."""
    w1, b1, w2, b2, w3, b3 = params
    return {
        "w1s": w1[:state_dim].astype(jnp.bfloat16),     # (state_dim, 256)
        "w1a": w1[state_dim:].astype(jnp.bfloat16),     # (action_dim, 256)
        "b1": b1.astype(jnp.float32).reshape(1, -1),    # (1, 256)
        "w2": w2.astype(jnp.bfloat16),                  # (256, 256)
        "b2": b2.astype(jnp.float32).reshape(1, -1),    # (1, 256)
        "w3": w3.astype(jnp.float32).reshape(1, -1),    # (1, 256)  VPU use, keep f32
        "b3": b3.astype(jnp.float32).reshape(1, 1),     # (1, 1)
    }


@functools.partial(jax.jit, static_argnames=("tile_b",))
def qnetwork_forward(x, a, packed, tile_b=_DEFAULT_TILE_B):
    """Pallas forward of QNetwork: relu(fc1(cat(x,a))) -> relu(fc2) -> fc3 -> squeeze."""
    B, state_dim = x.shape
    action_dim = a.shape[1]
    H = packed["w2"].shape[0]

    tb = _pick_batch_tile(B, tile_b)
    num_tiles = pl.cdiv(B, tb)

    def resident(shape):          # weights: same block every grid step -> stay VMEM-resident
        return pl.BlockSpec(shape, lambda i: (0, 0))

    flops = 2 * B * ((state_dim + action_dim) * H + H * H + H)
    weight_bytes = sum(int(v.size) * v.dtype.itemsize for v in packed.values())
    bytes_accessed = (x.size * x.dtype.itemsize + a.size * a.dtype.itemsize
                      + weight_bytes + B * 4)

    out = pl.pallas_call(
        _qnet_kernel,
        out_shape=jax.ShapeDtypeStruct((num_tiles, tb), jnp.float32),
        grid=(num_tiles,),
        in_specs=[
            pl.BlockSpec((tb, state_dim), lambda i: (i, 0)),   # x batch tile
            pl.BlockSpec((tb, action_dim), lambda i: (i, 0)),  # a batch tile
            resident((state_dim, H)),                          # w1 (state rows)
            resident((action_dim, H)),                         # w1 (action rows)
            resident((1, H)),                                  # b1
            resident((H, H)),                                  # w2
            resident((1, H)),                                  # b2
            resident((1, H)),                                  # w3 (row, f32)
            resident((1, 1)),                                  # b3
        ],
        out_specs=pl.BlockSpec((1, tb), lambda i: (i, 0)),     # lane-dense row per tile
        compiler_params=pltpu.CompilerParams(
            dimension_semantics=("parallel",),                 # v7x: shard batch over 2 TCs
            vmem_limit_bytes=32 * 1024 * 1024,                 # v5e: lift 16 MiB scoped default
        ),
        cost_estimate=pl.CostEstimate(flops=int(flops), transcendentals=0,
                                      bytes_accessed=int(bytes_accessed)),
    )(x, a, packed["w1s"], packed["w1a"], packed["b1"], packed["w2"],
      packed["b2"], packed["w3"], packed["b3"])

    q = out.reshape(-1)[:B]       # drop padded tail rows of the last tile
    # torch does x.squeeze() on the (B, 1) result (0-d when B == 1).
    return jnp.squeeze(q)


def init_qnetwork_params(key, state_dim, action_dim, hidden=_HIDDEN):
    """Deterministic PyTorch-style init: U(-1/sqrt(fan_in), 1/sqrt(fan_in))."""
    def linear(k, fan_in, fan_out):
        kw, kb = jax.random.split(k)
        bound = 1.0 / jnp.sqrt(fan_in)
        w = jax.random.uniform(kw, (fan_in, fan_out), jnp.float32, -bound, bound)
        b = jax.random.uniform(kb, (fan_out,), jnp.float32, -bound, bound)
        return w, b

    k1, k2, k3 = jax.random.split(key, 3)
    w1, b1 = linear(k1, state_dim + action_dim, hidden)
    w2, b2 = linear(k2, hidden, hidden)
    w3, b3 = linear(k3, hidden, 1)
    return (w1, b1, w2, b2, w3, b3)


if __name__ == "__main__":
    key = jax.random.PRNGKey(0)
    k_params, k_x, k_a = jax.random.split(key, 3)

    batch, state_dim, action_dim = 2, 8, 4
    params = init_qnetwork_params(k_params, state_dim, action_dim)
    packed = pack_qnetwork_params(params, state_dim)   # one-time, reused every call

    x = jax.random.normal(k_x, (batch, state_dim), jnp.float32)
    a = jax.random.normal(k_a, (batch, action_dim), jnp.float32)

    q = qnetwork_forward(x, a, packed)
    jax.block_until_ready(q)

    # sanity: matches pure-JAX f32 reference (bf16 matmul weights -> loose tol)
    xa = jnp.concatenate([x, a], axis=-1)
    w1, b1, w2, b2, w3, b3 = params
    h = jnp.maximum(xa @ w1 + b1, 0.0)
    h = jnp.maximum(h @ w2 + b2, 0.0)
    ref = jnp.squeeze(h @ w3 + b3)
    assert q.shape == (batch,), q.shape
    assert jnp.allclose(q, ref, atol=5e-2, rtol=5e-2), (q, ref)

    print("KERNEL_OK")
</pallas_src>

<mosaic_0001>
module attributes {stable_mosaic.version = 11 : i64} {
  func.func @_qnet_kernel(%arg0: i32, %arg1: memref<8x8xf32, #tpu.memory_space<vmem>>, %arg2: memref<8x4xf32, #tpu.memory_space<vmem>>, %arg3: memref<8x256xbf16, #tpu.memory_space<vmem>>, %arg4: memref<4x256xbf16, #tpu.memory_space<vmem>>, %arg5: memref<1x256xf32, #tpu.memory_space<vmem>>, %arg6: memref<256x256xbf16, #tpu.memory_space<vmem>>, %arg7: memref<1x256xf32, #tpu.memory_space<vmem>>, %arg8: memref<1x256xf32, #tpu.memory_space<vmem>>, %arg9: memref<1x1xf32, #tpu.memory_space<vmem>>, %arg10: memref<1x8xf32, #tpu.memory_space<vmem>>) attributes {dimension_semantics = [#tpu.dimension_semantics<parallel>], iteration_bounds = array<i64: 1>, scalar_prefetch = 0 : i64, scratch_operands = 0 : i64, tpu.core_type = #tpu.core_type<tc>, window_params = [{transform_indices = @transform_0, window_bounds = array<i64: 8, 8>}, {transform_indices = @transform_1, window_bounds = array<i64: 8, 4>}, {pipeline_mode = #tpu.pipeline_mode<synchronous>, transform_indices = @transform_2, window_bounds = array<i64: 8, 256>}, {pipeline_mode = #tpu.pipeline_mode<synchronous>, transform_indices = @transform_3, window_bounds = array<i64: 4, 256>}, {pipeline_mode = #tpu.pipeline_mode<synchronous>, transform_indices = @transform_4, window_bounds = array<i64: 1, 256>}, {pipeline_mode = #tpu.pipeline_mode<synchronous>, transform_indices = @transform_5, window_bounds = array<i64: 256, 256>}, {pipeline_mode = #tpu.pipeline_mode<synchronous>, transform_indices = @transform_6, window_bounds = array<i64: 1, 256>}, {pipeline_mode = #tpu.pipeline_mode<synchronous>, transform_indices = @transform_7, window_bounds = array<i64: 1, 256>}, {pipeline_mode = #tpu.pipeline_mode<synchronous>, transform_indices = @transform_8, window_bounds = array<i64: 1, 1>}, {transform_indices = @transform_9, window_bounds = array<i64: 1, 8>}]} {
    %c0 = arith.constant 0 : index
    %c0_0 = arith.constant 0 : index
    %0 = vector.load %arg1[%c0, %c0_0] : memref<8x8xf32, #tpu.memory_space<vmem>>, vector<8x8xf32>
    %1 = arith.truncf %0 : vector<8x8xf32> to vector<8x8xbf16>
    %c0_1 = arith.constant 0 : index
    %c0_2 = arith.constant 0 : index
    %2 = vector.load %arg3[%c0_1, %c0_2] : memref<8x256xbf16, #tpu.memory_space<vmem>>, vector<8x256xbf16>
    %cst = arith.constant dense<0.000000e+00> : vector<8x256xf32>
    %3 = tpu.matmul %1, %2, %cst {dimension_numbers = #tpu.dot_dimension_numbers<[1], [0], [0], [1], [0, 0, 1, 1], [], []>} : vector<8x8xbf16>, vector<8x256xbf16>, vector<8x256xf32> -> vector<8x256xf32>
    %c0_3 = arith.constant 0 : index
    %c0_4 = arith.constant 0 : index
    %4 = vector.load %arg2[%c0_3, %c0_4] : memref<8x4xf32, #tpu.memory_space<vmem>>, vector<8x4xf32>
    %5 = arith.truncf %4 : vector<8x4xf32> to vector<8x4xbf16>
    %c0_5 = arith.constant 0 : index
    %c0_6 = arith.constant 0 : index
    %6 = vector.load %arg4[%c0_5, %c0_6] : memref<4x256xbf16, #tpu.memory_space<vmem>>, vector<4x256xbf16>
    %cst_7 = arith.constant dense<0.000000e+00> : vector<8x256xf32>
    %7 = tpu.matmul %5, %6, %cst_7 {dimension_numbers = #tpu.dot_dimension_numbers<[1], [0], [0], [1], [0, 0, 1, 1], [], []>} : vector<8x4xbf16>, vector<4x256xbf16>, vector<8x256xf32> -> vector<8x256xf32>
    %8 = arith.addf %3, %7 : vector<8x256xf32>
    %c0_8 = arith.constant 0 : index
    %c0_9 = arith.constant 0 : index
    %9 = vector.load %arg5[%c0_8, %c0_9] : memref<1x256xf32, #tpu.memory_space<vmem>>, vector<1x256xf32>
    %10 = vector.broadcast %9 : vector<1x256xf32> to vector<8x256xf32>
    %11 = arith.addf %8, %10 : vector<8x256xf32>
    %cst_10 = arith.constant 0.000000e+00 : f32
    %12 = vector.broadcast %cst_10 : f32 to vector<8x256xf32>
    %13 = arith.maximumf %11, %12 : vector<8x256xf32>
    %14 = arith.truncf %13 : vector<8x256xf32> to vector<8x256xbf16>
    %c0_11 = arith.constant 0 : index
    %c0_12 = arith.constant 0 : index
    %15 = vector.load %arg6[%c0_11, %c0_12] : memref<256x256xbf16, #tpu.memory_space<vmem>>, vector<256x256xbf16>
    %cst_13 = arith.constant dense<0.000000e+00> : vector<8x256xf32>
    %16 = tpu.matmul %14, %15, %cst_13 {dimension_numbers = #tpu.dot_dimension_numbers<[1], [0], [0], [1], [0, 0, 1, 1], [], []>} : vector<8x256xbf16>, vector<256x256xbf16>, vector<8x256xf32> -> vector<8x256xf32>
    %c0_14 = arith.constant 0 : index
    %c0_15 = arith.constant 0 : index
    %17 = vector.load %arg7[%c0_14, %c0_15] : memref<1x256xf32, #tpu.memory_space<vmem>>, vector<1x256xf32>
    %18 = vector.broadcast %17 : vector<1x256xf32> to vector<8x256xf32>
    %19 = arith.addf %16, %18 : vector<8x256xf32>
    %cst_16 = arith.constant 0.000000e+00 : f32
    %20 = vector.broadcast %cst_16 : f32 to vector<8x256xf32>
    %21 = arith.maximumf %19, %20 : vector<8x256xf32>
    %c0_17 = arith.constant 0 : index
    %c0_18 = arith.constant 0 : index
    %22 = vector.load %arg8[%c0_17, %c0_18] : memref<1x256xf32, #tpu.memory_space<vmem>>, vector<1x256xf32>
    %23 = vector.broadcast %22 : vector<1x256xf32> to vector<8x256xf32>
    %24 = arith.mulf %21, %23 : vector<8x256xf32>
    %cst_19 = arith.constant dense<0.000000e+00> : vector<8xf32>
    %25 = vector.multi_reduction <add>, %24, %cst_19 [1] : vector<8x256xf32> to vector<8xf32>
    %26 = vector.shape_cast %25 : vector<8xf32> to vector<8x1xf32>
    %c0_20 = arith.constant 0 : index
    %c0_21 = arith.constant 0 : index
    %27 = vector.load %arg9[%c0_20, %c0_21] : memref<1x1xf32, #tpu.memory_space<vmem>>, vector<1x1xf32>
    %28 = vector.broadcast %27 : vector<1x1xf32> to vector<8x1xf32>
    %29 = arith.addf %26, %28 : vector<8x1xf32>
    %30 = tpu.transpose %29, [1, 0] : vector<8x1xf32> -> vector<1x8xf32>
    %c0_22 = arith.constant 0 : index
    %c0_23 = arith.constant 0 : index
    %31 = vector.load %arg10[%c0_22, %c0_23] : memref<1x8xf32, #tpu.memory_space<vmem>>, vector<1x8xf32>
    tpu.vector_store %arg10[%c0_22, %c0_23], %30 {strides = array<i32>} : memref<1x8xf32, #tpu.memory_space<vmem>>, vector<1x8xf32>,
    return
  }
  func.func @transform_0(%arg0: i32) -> (i32, i32) {
    %c0_i32 = arith.constant 0 : i32
    %c0_i32_0 = arith.constant 0 : i32
    return %arg0, %c0_i32 : i32, i32
  }
  func.func @transform_1(%arg0: i32) -> (i32, i32) {
    %c0_i32 = arith.constant 0 : i32
    %c0_i32_0 = arith.constant 0 : i32
    return %arg0, %c0_i32 : i32, i32
  }
  func.func @transform_2(%arg0: i32) -> (i32, i32) {
    %c0_i32 = arith.constant 0 : i32
    %c0_i32_0 = arith.constant 0 : i32
    %c0_i32_1 = arith.constant 0 : i32
    return %c0_i32, %c0_i32_0 : i32, i32
  }
  func.func @transform_3(%arg0: i32) -> (i32, i32) {
    %c0_i32 = arith.constant 0 : i32
    %c0_i32_0 = arith.constant 0 : i32
    %c0_i32_1 = arith.constant 0 : i32
    return %c0_i32, %c0_i32_0 : i32, i32
  }
  func.func @transform_4(%arg0: i32) -> (i32, i32) {
    %c0_i32 = arith.constant 0 : i32
    %c0_i32_0 = arith.constant 0 : i32
    %c0_i32_1 = arith.constant 0 : i32
    return %c0_i32, %c0_i32_0 : i32, i32
  }
  func.func @transform_5(%arg0: i32) -> (i32, i32) {
    %c0_i32 = arith.constant 0 : i32
    %c0_i32_0 = arith.constant 0 : i32
    %c0_i32_1 = arith.constant 0 : i32
    return %c0_i32, %c0_i32_0 : i32, i32
  }
  func.func @transform_6(%arg0: i32) -> (i32, i32) {
    %c0_i32 = arith.constant 0 : i32
    %c0_i32_0 = arith.constant 0 : i32
    %c0_i32_1 = arith.constant 0 : i32
    return %c0_i32, %c0_i32_0 : i32, i32
  }
  func.func @transform_7(%arg0: i32) -> (i32, i32) {
    %c0_i32 = arith.constant 0 : i32
    %c0_i32_0 = arith.constant 0 : i32
    %c0_i32_1 = arith.constant 0 : i32
    return %c0_i32, %c0_i32_0 : i32, i32
  }
  func.func @transform_8(%arg0: i32) -> (i32, i32) {
    %c0_i32 = arith.constant 0 : i32
    %c0_i32_0 = arith.constant 0 : i32
    %c0_i32_1 = arith.constant 0 : i32
    return %c0_i32, %c0_i32_0 : i32, i32
  }
  func.func @transform_9(%arg0: i32) -> (i32, i32) {
    %c0_i32 = arith.constant 0 : i32
    %c0_i32_0 = arith.constant 0 : i32
    return %arg0, %c0_i32 : i32, i32
  }
}

</mosaic_0001>

<bundles_post_ra>
// kernel: qnetwork_forward.1
= control target key start
LH: loop header
LB: loop body
LE: loop exit
PB: predicated region body
PF: predicated region fallthrough
CT: control target
= control target key end

     0   :  { %s868_s0 = inlined_call_operand.vmem [shape: f32[2,8], index: 0, kind: input, shape index: {}]   ;;  %s869_s1 = inlined_call_operand.hbm [shape: f32[2,4], index: 1, kind: input, shape index: {}]   ;;  %s870_s2 = inlined_call_operand.vmem [shape: bf16[8,256], index: 2, kind: input, shape index: {}]   ;;  %s871_s3 = inlined_call_operand.vmem [shape: bf16[4,256], index: 3, kind: input, shape index: {}]   ;;  %s872_s4 = inlined_call_operand.hbm [shape: f32[1,256], index: 4, kind: input, shape index: {}]   ;;  %s873_s5 = inlined_call_operand.hbm [shape: bf16[256,256], index: 5, kind: input, shape index: {}]   ;;  %s874_s6 = inlined_call_operand.hbm [shape: f32[1,256], index: 6, kind: input, shape index: {}]   ;;  %s875_s7 = inlined_call_operand.vmem [shape: f32[1,256], index: 7, kind: input, shape index: {}]   ;;  %s876_s8 = inlined_call_operand.<no memory space> [shape: f32[1,1], index: 8, kind: input, shape index: {}]   ;;  %s877_s9 = inlined_call_operand.vmem [shape: f32[1,8], index: 9, kind: output, shape index: {}]  }
   0x1   :  { %v14_v0 = vstv %s876_s8 }
   0x2   :  { %15 = vst [vmem:[#allocation2] sm:$0x1] %v14_v0 }
   0x3   :  { %16 = vsyncpa [#allocation4], 0 }
   0x4   :  { %17 = vsyncpa [#allocation6], 0 }
   0x5   :  { %18 = vsyncpa [#allocation9], 0 }
   0x6   :  { %25 = vsyncadd [#allocation4], 96  ;;  %s735_s11 = smov [#allocation5]   ;;  %s736_s13 = smov [#allocation3]  }
   0x7   :  { %s43_s12 = sshll.u32 %s735_s11, 4  ;;  %s26_s14 = sshll.u32 %s736_s13, 4  ;;  %s44_s12 = int_to_ptr.vmem [resolvable:$true] %s43_s12  ;;  %s797_s14 = int_to_ptr.vmem [resolvable:$true] %s26_s14 }
   0x8   :  { %s641_s17 = scalar_lea.hbm %s872_s4, 32 }
   0x9   :  { %p642_p0 = scmp.ne.s32.totalorder %s872_s4, %s641_s17  ;;  %p645_p1 = scmp.lt.u32.totalorder %s641_s17, %s872_s4 }
   0xb   :  { %p647_p2 = pnand %p645_p1, %p642_p0 }
   0xd   :  { %650 = shalt.err (!%p647_p2)
}
   0xe   :  { %s651_s21 = scalar_lea.vmem %s44_s12, 32  ;;  %p656_p4 = scmp.lt.s32.totalorder %s44_s12, %s44_s12 }
   0xf   :  { %p652_p3 = scmp.ne.s32.totalorder %s44_s12, %s651_s21  ;;  %p657_p5 = scmp.lt.s32.totalorder %s651_s21, %s651_s21 }
  0x11   :  { %p658_p6 = por %p657_p5, %p656_p4 }
  0x13   :  { %p659_p7 = pnand %p658_p6, %p652_p3 }
  0x15   :  { %662 = shalt.err (!%p659_p7)
}
  0x16   :  { %46 = dma.hbm_to_vmem [thread:$0]  %s872_s4, 32, %s44_s12, [#allocation6]  }
  0x17   :  { %s663_s26 = scalar_lea.hbm %s869_s1, 32 }
  0x18   :  { %p664_p8 = scmp.ne.s32.totalorder %s869_s1, %s663_s26  ;;  %p667_p9 = scmp.lt.u32.totalorder %s663_s26, %s869_s1 }
  0x1a   :  { %p669_p10 = pnand %p667_p9, %p664_p8 }
  0x1c   :  { %672 = shalt.err (!%p669_p10)
}
  0x1d   :  { %s673_s10 = scalar_lea.vmem %s797_s14, 32  ;;  %s677_s4 = scalar_lea.vmem %s797_s14, 128 }
  0x1e   :  { %p674_p11 = scmp.ne.s32.totalorder %s797_s14, %s673_s10  ;;  %p678_p12 = scmp.lt.s32.totalorder %s797_s14, %s797_s14 }
  0x1f   :  { %p679_p13 = scmp.lt.s32.totalorder %s677_s4, %s673_s10 }
  0x21   :  { %p680_p0 = por %p679_p13, %p678_p12 }
  0x23   :  { %p681_p1 = pnand %p680_p0, %p674_p11 }
  0x25   :  { %684 = shalt.err (!%p681_p1)
}
  0x26   :  { %s737_s11 = smov 32   ;;  %s738_s12 = smov 2  }
  0x27   :  { %32 = dma.hbm_to_vmem [thread:$0]  %s869_s1, 32, %s797_s14, [#allocation4], %s737_s11, %s737_s11, %s738_s12  }
  0x28   :  { %s739_s16 = smov [#allocation7]   ;;  %s685_s8 = scalar_lea.hbm %s873_s5, 4096 }
  0x29   :  { %s52_s17 = sshll.u32 %s739_s16, 4  ;;  %p686_p2 = scmp.ne.s32.totalorder %s873_s5, %s685_s8  ;;  %s53_s17 = int_to_ptr.vmem [resolvable:$true] %s52_s17 }
  0x2a   :  { %p689_p3 = scmp.lt.u32.totalorder %s685_s8, %s873_s5 }
  0x2c   :  { %p691_p4 = pnand %p689_p3, %p686_p2 }
  0x2e   :  { %694 = shalt.err (!%p691_p4)
}
  0x2f   :  { %s695_s24 = scalar_lea.vmem %s53_s17, 4096  ;;  %p700_p6 = scmp.lt.s32.totalorder %s53_s17, %s53_s17 }
  0x30   :  { %p696_p5 = scmp.ne.s32.totalorder %s53_s17, %s695_s24  ;;  %p701_p7 = scmp.lt.s32.totalorder %s695_s24, %s695_s24 }
  0x32   :  { %p702_p8 = por %p701_p7, %p700_p6 }
  0x34   :  { %p703_p9 = pnand %p702_p8, %p696_p5 }
  0x36   :  { %706 = shalt.err (!%p703_p9)
}
  0x37   :  { %s740_s1 = smov 128   ;;  %s741_s14 = smov 8  }
  0x38   :  { %58 = dma.hbm_to_vmem [thread:$0]  %s873_s5, 4096, %s53_s17, [#allocation6], %s740_s1, %s740_s1, %s741_s14  }
  0x39   :  { %s742_s27 = smov [#allocation8]   ;;  %s707_s10 = scalar_lea.hbm %s874_s6, 32 }
  0x3a   :  { %s65_s28 = sshll.u32 %s742_s27, 4  ;;  %p708_p10 = scmp.ne.s32.totalorder %s874_s6, %s707_s10  ;;  %s66_s28 = int_to_ptr.vmem [resolvable:$true] %s65_s28 }
  0x3b   :  { %p711_p11 = scmp.lt.u32.totalorder %s707_s10, %s874_s6 }
  0x3d   :  { %p713_p12 = pnand %p711_p11, %p708_p10 }
  0x3f   :  { %716 = shalt.err (!%p713_p12)
}
  0x40   :  { %s717_s15 = scalar_lea.vmem %s66_s28, 32  ;;  %p722_p0 = scmp.lt.s32.totalorder %s66_s28, %s66_s28 }
  0x41   :  { %p718_p13 = scmp.ne.s32.totalorder %s66_s28, %s717_s15  ;;  %p723_p1 = scmp.lt.s32.totalorder %s717_s15, %s717_s15 }
  0x43   :  { %p724_p2 = por %p723_p1, %p722_p0 }
  0x45   :  { %p725_p3 = pnand %p724_p2, %p718_p13 }
  0x47   :  { %728 = shalt.err (!%p725_p3)
}
  0x48   :  { %68 = dma.hbm_to_vmem [thread:$0]  %s874_s6, 32, %s66_s28, [#allocation9]  }
  0x49   :  { %729 = dma.done.wait [#allocation4], 128  }
  0x4a   :  { %730 = vsyncadd [#allocation4], 4294967168 }
  0x4b   :  { %731 = dma.done.wait [#allocation6], 4128  }
  0x4c   :  { %732 = vsyncadd [#allocation6], 4294963168 }
  0x4d   :  { %733 = dma.done.wait [#allocation9], 32  }
  0x4e   :  { %734 = vsyncadd [#allocation9], 4294967264  ;;  %v743_v1 = vmov 0   ;;  %vm105_vm0 = vcmask 1041408   ;;  %v89_v3 = vld [vmem:[#allocation3] sm:$0xff]  ;;  %vm162_vm1 = vcmask 1043456   ;;  %v212_v45 = vlaneseq }
  0x4f   :  { %144 = vmatprep.mubr.bf16.mxu1 %v743_v1  ;;  %v541_v2 = vld.sshfl [vmem:[%s871_s3] sm:$0x33 pattern:$0x76325410]  ;;  %v593_v9 = vld [vmem:[#allocation7 + $0x4] ss:$8 sps:$4 sm:$0xff]   ;;  %v90_v11 = vpack.c.bf16 %v89_v3, %v89_v3 }
  0x50   :  { %v88_v4 = vld [vmem:[%s870_s2] sm:$0xff]  ;;  %v100_v5 = vcombine.high %v541_v2, %v541_v2  ;;  %v107_v6 = vsel %vm105_vm0, %v541_v2, 0  ;;  %v595_v10 = vld [vmem:[#allocation7] ss:$8 sps:$4 sm:$0xff]   ;;  %vm101_vm2 = vcmask 31744   ;;  %432 = vmatprep.subr.bf16.mxu0 %v593_v9  ;;  %vm158_vm3 = vcmask 64512  }
  0x51   :  { %v545_v7 = vcombine.high %v88_v4, %v88_v4  ;;  %v544_v8 = vcombine.low %v88_v4, %v88_v4  ;;  %v596_v12 = vld [vmem:[#allocation7 + $0x14] ss:$8 sps:$4 sm:$0xff]   ;;  %433 = vmatpush1.bf16.msra.mxu0 %v595_v10  ;;  %v598_v14 = vld [vmem:[#allocation7 + $0x10] ss:$8 sps:$4 sm:$0xff]   ;;  %v599_v15 = vld [vmem:[#allocation7 + $0x24] ss:$8 sps:$4 sm:$0xff]  }
  0x52   :  { %542 = vmatprep.subr.msk.bf16.mxu1 %vm105_vm0, %v100_v5  ;;  %434 = vmatprep.subr.bf16.mxu0 %v596_v12  ;;  %v86_v16 = vld [vmem:[%s868_s0] sm:$0xff]  ;;  %v601_v17 = vld [vmem:[#allocation7 + $0x20] ss:$8 sps:$4 sm:$0xff]   ;;  %v605_v21 = vld [vmem:[#allocation7 + $0x44] ss:$8 sps:$4 sm:$0xff]   ;;  %v213_v46 = vshrl.u32 %v212_v45, 7 }
  0x53   :  { %113 = vmatpush1.bf16.msra.mxu1 %v107_v6  ;;  %v164_v13 = vsel %vm162_vm1, %v544_v8, 0  ;;  %v602_v18 = vld [vmem:[#allocation7 + $0x34] ss:$8 sps:$4 sm:$0xff]   ;;  %v87_v19 = vpack.c.bf16 %v86_v16, %v86_v16  ;;  %v604_v20 = vld [vmem:[#allocation7 + $0x30] ss:$8 sps:$4 sm:$0xff]   ;;  %vm532_vm4 = vcmask 57344  }
  0x54   :  { %546 = vmatprep.subr.msk.bf16.mxu1 %vm162_vm1, %v545_v7  ;;  %v607_v22 = vld [vmem:[#allocation7 + $0x40] ss:$8 sps:$4 sm:$0xff]   ;;  %v608_v23 = vld [vmem:[#allocation7 + $0x54] ss:$8 sps:$4 sm:$0xff]   ;;  %v610_v24 = vld [vmem:[#allocation7 + $0x50] ss:$8 sps:$4 sm:$0xff]  }
  0x55   :  { %435 = vmatpush1.bf16.msra.mxu0 %v598_v14  ;;  %v611_v25 = vld [vmem:[#allocation7 + $0x64] ss:$8 sps:$4 sm:$0xff]   ;;  %v613_v26 = vld [vmem:[#allocation7 + $0x60] ss:$8 sps:$4 sm:$0xff]   ;;  %v614_v27 = vld [vmem:[#allocation7 + $0x74] ss:$8 sps:$4 sm:$0xff]  }
  0x56   :  { %543 = vmatmul.mubr.msk.bf16.vlgmr.msra.gmra.mrb[0].mxu1 %vm101_vm2, %v90_v11  ;;  %436 = vmatprep.subr.bf16.mxu0 %v599_v15  ;;  %v616_v28 = vld [vmem:[#allocation7 + $0x70] ss:$8 sps:$4 sm:$0xff]   ;;  %v617_v29 = vld [vmem:[#allocation7 + $0x84] ss:$8 sps:$4 sm:$0xff]   ;;  %v619_v30 = vld [vmem:[#allocation7 + $0x80] ss:$8 sps:$4 sm:$0xff]  }
  0x57   :  { %170 = vmatpush1.bf16.msra.mxu1 %v164_v13  ;;  %201 = vmatprep.mubr.bf16.mxu1 %v743_v1  ;;  %v620_v31 = vld [vmem:[#allocation7 + $0x94] ss:$8 sps:$4 sm:$0xff]   ;;  %v622_v32 = vld [vmem:[#allocation7 + $0x90] ss:$8 sps:$4 sm:$0xff]   ;;  %v623_v33 = vld [vmem:[#allocation7 + $0xa4] ss:$8 sps:$4 sm:$0xff]  }
  0x58   :  { %v625_v34 = vld [vmem:[#allocation7 + $0xa0] ss:$8 sps:$4 sm:$0xff]   ;;  %v626_v35 = vld [vmem:[#allocation7 + $0xb4] ss:$8 sps:$4 sm:$0xff]   ;;  %v628_v36 = vld [vmem:[#allocation7 + $0xb0] ss:$8 sps:$4 sm:$0xff]  }
  0x59   :  { %437 = vmatpush1.bf16.msra.mxu0 %v601_v17  ;;  %v629_v37 = vld [vmem:[#allocation7 + $0xc4] ss:$8 sps:$4 sm:$0xff]   ;;  %v631_v38 = vld [vmem:[#allocation7 + $0xc0] ss:$8 sps:$4 sm:$0xff]   ;;  %v632_v39 = vld [vmem:[#allocation7 + $0xd4] ss:$8 sps:$4 sm:$0xff]  }
  0x5a   :  { %438 = vmatprep.subr.bf16.mxu0 %v602_v18  ;;  %v634_v40 = vld [vmem:[#allocation7 + $0xd0] ss:$8 sps:$4 sm:$0xff]   ;;  %v635_v41 = vld [vmem:[#allocation7 + $0xe4] ss:$8 sps:$4 sm:$0xff]   ;;  %v637_v42 = vld [vmem:[#allocation7 + $0xe0] ss:$8 sps:$4 sm:$0xff]  }
  0x5b   :  { %v638_v43 = vld [vmem:[#allocation7 + $0xf4] ss:$8 sps:$4 sm:$0xff]   ;;  %v640_v44 = vld [vmem:[#allocation7 + $0xf0] ss:$8 sps:$4 sm:$0xff]   ;;  %v214_v51 = vsub.s32 0, %v213_v46  ;;  %v218_v53 = vsub.s32 1, %v213_v46 }
  0x5c   :  { %v210_v52 = vld [vmem:[#allocation5] sm:$0x3]  ;;  %v260_v4 = vld [vmem:[#allocation8] sm:$0x3]  ;;  %v475_v7 = vld [vmem:[%s875_s7] sm:$0x3] }
  0x5d   :  { %439 = vmatpush1.bf16.msra.mxu0 %v604_v20  ;;  %v215_v54 = vrot.slane %v210_v52, %v214_v51  ;;  %v219_v56 = vrot.slane %v210_v52, %v218_v53  ;;  %v265_v5 = vrot.slane %v260_v4, %v214_v51  ;;  %v269_v6 = vrot.slane %v260_v4, %v218_v53 }
  0x5e   :  { %547 = vmatmul.mubr.msk.bf16.vlgmr.msra.gmra.mrb[4].mxu1 %vm158_vm3, %v87_v19  ;;  %440 = vmatprep.subr.bf16.mxu0 %v605_v21  ;;  %v480_v11 = vrot.slane %v475_v7, %v214_v51  ;;  %v484_v14 = vrot.slane %v475_v7, %v218_v53  ;;  %v580_v21 = vld [vmem:[#allocation2] ss:$0 sm:$0xff] }
  0x61   :  { %441 = vmatpush1.bf16.msra.mxu0 %v607_v22 }
  0x62   :  { %442 = vmatprep.subr.bf16.mxu0 %v608_v23 }
  0x65   :  { %443 = vmatpush1.bf16.msra.mxu0 %v610_v24 }
  0x66   :  { %444 = vmatprep.subr.bf16.mxu0 %v611_v25 }
  0x69   :  { %445 = vmatpush1.bf16.msra.mxu0 %v613_v26 }
  0x6a   :  { %446 = vmatprep.subr.bf16.mxu0 %v614_v27 }
  0x6d   :  { %447 = vmatpush1.bf16.msra.mxu0 %v616_v28 }
  0x6e   :  { %448 = vmatprep.subr.bf16.mxu0 %v617_v29 }
  0x71   :  { %449 = vmatpush1.bf16.msra.mxu0 %v619_v30 }
  0x72   :  { %450 = vmatprep.subr.bf16.mxu0 %v620_v31 }
  0x75   :  { %451 = vmatpush1.bf16.msra.mxu0 %v622_v32 }
  0x76   :  { %452 = vmatprep.subr.bf16.mxu0 %v623_v33 }
  0x79   :  { %453 = vmatpush1.bf16.msra.mxu0 %v625_v34 }
  0x7a   :  { %454 = vmatprep.subr.bf16.mxu0 %v626_v35 }
  0x7d   :  { %455 = vmatpush1.bf16.msra.mxu0 %v628_v36 }
  0x7e   :  { %456 = vmatprep.subr.bf16.mxu0 %v629_v37 }
  0x81   :  { %457 = vmatpush1.bf16.msra.mxu0 %v631_v38 }
  0x82   :  { %458 = vmatprep.subr.bf16.mxu0 %v632_v39 }
  0x85   :  { %459 = vmatpush1.bf16.msra.mxu0 %v634_v40 }
  0x86   :  { %460 = vmatprep.subr.bf16.mxu0 %v635_v41 }
  0x89   :  { %461 = vmatpush1.bf16.msra.mxu0 %v637_v42 }
  0x8a   :  { %462 = vmatprep.subr.bf16.mxu0 %v638_v43 }
  0x8d   :  { %463 = vmatpush1.bf16.msra.mxu0 %v640_v44 }
 0x129   :  { %v146_v47 = vpop.f32.mrb[0].mxu1 }
 0x12a   :  { %v148_v48 = vpop.f32.mrb[1].mxu1 }
 0x12b   :  { %v150_v49 = vpop.f32.mrb[2].mxu1 }
 0x12c   :  { %v151_v50 = vpop.f32.mrb[3].mxu1 }
 0x131   :  { %v203_v55 = vpop.f32.mrb[4].mxu1 }
 0x132   :  { %v204_v57 = vadd.f32 %v203_v55, %v146_v47  ;;  %v205_v58 = vpop.f32.mrb[5].mxu1 }
 0x133   :  { %v206_v59 = vadd.f32 %v205_v58, %v148_v48  ;;  %v207_v60 = vpop.f32.mrb[6].mxu1 }
 0x134   :  { %v222_v61 = vadd.f32 %v215_v54, %v204_v57  ;;  %v208_v62 = vpop.f32.mrb[7].mxu1 }
 0x135   :  { %v223_v63 = vadd.f32 %v219_v56, %v206_v59 }
 0x136   :  { %v224_v0 = vmax.f32 %v222_v61, 0.0 }
 0x137   :  { %v225_v1 = vmax.f32 %v223_v63, 0.0 }
 0x138   :  { %v226_v3 = vpack.c.bf16 %v224_v0, %v224_v0 }
 0x139   :  { %v227_v2 = vpack.c.bf16 %v225_v1, %v225_v1 }
 0x13b   :  { %464 = vmatprep.mubr.bf16.mxu0 %v227_v2 }
 0x13c   :  { %465 = vmatmul.mubr.bf16.vlgmr.msra.gmra.mrb[0].mxu0 %v226_v3 }
 0x20f   :  { %v466_v8 = vpop.f32.mrb[0].mxu0 }
 0x210   :  { %v467_v9 = vadd.f32 %v466_v8, %v265_v5  ;;  %v468_v10 = vpop.f32.mrb[1].mxu0 }
 0x211   :  { %v469_v12 = vadd.f32 %v468_v10, %v269_v6  ;;  %v470_v13 = vpop.f32.mrb[2].mxu0 }
 0x212   :  { %v473_v15 = vmax.f32 %v467_v9, 0.0  ;;  %v471_v16 = vpop.f32.mrb[3].mxu0 }
 0x213   :  { %v474_v17 = vmax.f32 %v469_v12, 0.0 }
 0x214   :  { %v487_v18 = vmul.f32 %v480_v11, %v473_v15 }
 0x215   :  { %v488_v19 = vmul.f32 %v484_v14, %v474_v17 }
 0x217   :  { %v489_v20 = vadd.f32 %v488_v19, %v487_v18 }
 0x219   :  { %490 = vadd.xlane.f32.xlu0 %v489_v20 }
 0x2a6   :  { %v491_v22 = vpop.xlane.xlu0 %490 }
 0x2a7   :  { %v499_v23 = vadd.f32 %v580_v21, %v491_v22 }
 0x2a9   :  { %500 = vxpose.xlu0.b32.start.end [1/1] (short) (narrow) %v499_v23, 8 }
 0x329   :  { %v516_v24 = vpop.trf.xlu0 }
 0x32a   :  { %533 = vst.msk [vmem:[%s877_s9] sm:$0x1] %vm532_vm4, %v516_v24 }
 0x32b   :  { %538 = vsyncpa [#allocation4], 1 }
 0x32c   :  { %539 = vsyncpa [#allocation6], 1 }
 0x32d   :  { %540 = vsyncpa [#allocation9], 1 }

</bundles_post_ra>
